<compile_context>
chip_gen: v7x
topology: tpu7x:2x2x1
jax: 0.10.0
libtpu: 0.0.40
codegen_flags: <defaults>
</compile_context>

<pallas_src>
import jax
import jax.numpy as jnp
from jax.experimental import pallas as pl
from jax.experimental.pallas import tpu as pltpu

SUBLANE = 8


def _round_up(x, m):
    return ((x + m - 1) // m) * m


def nbeats_block_kernel(x_ref, w1_ref, b1_ref, w2_ref, b2_ref,
                        w3_ref, b3_ref, w4_ref, b4_ref, out_ref):
    """Fused fc1 -> relu -> fc2 -> relu -> fc3 -> relu -> fc4 for one batch tile."""
    x = x_ref[...]                                                  # (bm, in_f)

    h = jnp.dot(x, w1_ref[...], preferred_element_type=jnp.float32) + b1_ref[...]
    h = jnp.maximum(h, 0.0).astype(w2_ref.dtype)

    h = jnp.dot(h, w2_ref[...], preferred_element_type=jnp.float32) + b2_ref[...]
    h = jnp.maximum(h, 0.0).astype(w3_ref.dtype)

    h = jnp.dot(h, w3_ref[...], preferred_element_type=jnp.float32) + b3_ref[...]
    h = jnp.maximum(h, 0.0).astype(w4_ref.dtype)

    out = jnp.dot(h, w4_ref[...], preferred_element_type=jnp.float32) + b4_ref[...]
    out_ref[...] = out.astype(out_ref.dtype)                        # (bm, out_f)


def prepare_block_params(params, compute_dtype=jnp.float32):
    """Slice out the LAST block (the only one that survives the PyTorch loop)
    and cast once.  Hoisted out of the forward path per the perf review: call
    this once and reuse the returned tuple for every forward call."""
    def w(k):  # matmul operands in compute dtype (bf16 on v5e/v6e/v7x is fine)
        return params[k][-1].astype(compute_dtype)

    def b(k):  # bias add + ReLU stay f32 (MXU accumulates f32; v5e has no bf16 VALU)
        return params[k][-1].astype(jnp.float32)

    return (w("w1"), b("b1"), w("w2"), b("b2"),
            w("w3"), b("b3"), w("w4"), b("b4"))


def nbeats_forward(x, block_params, *, n_ahead, output_size,
                   batch_tile=1024, vmem_budget_bytes=40 << 20,
                   weight_buffer_count=None):
    """x: (batch, seq_len, input_dim); block_params: output of prepare_block_params.

    Returns (batch, n_ahead, output_size), identical to the PyTorch forward
    (whose loop keeps only the last block's output).
    """
    batch = x.shape[0]
    x_flat = x.reshape(batch, -1)                                   # (B, in_f)
    in_f = x_flat.shape[1]
    out_f = n_ahead * output_size

    w1, b1, w2, b2, w3, b3, w4, b4 = block_params
    hidden = w1.shape[1]
    # Guard against un-transposed nn.Linear weights (they are (out, in)).
    assert w1.shape == (in_f, hidden), f"w1 must be (in, hidden), got {w1.shape}"
    assert w2.shape == (hidden, hidden) and w3.shape == (hidden, hidden)
    assert w4.shape == (hidden, out_f), f"w4 must be (hidden, out), got {w4.shape}"

    compute_dtype = w1.dtype
    cbytes = jnp.dtype(compute_dtype).itemsize

    # --- batch tiling: pad batch only to a sublane multiple, ragged-tail grid ---
    b_p = _round_up(batch, SUBLANE)
    bm = _round_up(min(batch_tile, b_p), SUBLANE)
    # v7x megacore: if everything fits one tile but is big enough, split into
    # >= 2 tiles so the second TensorCore gets work (no effect on v5e/v6e).
    if bm >= b_p and b_p >= 2 * SUBLANE:
        bm = _round_up(-(-b_p // 2), SUBLANE)

    def vmem_est(bm_):
        x_t = bm_ * in_f * cbytes                 # x tile
        o_t = bm_ * out_f * 4                     # out tile (f32)
        w_b = (in_f * hidden + 2 * hidden * hidden + hidden * out_f) * cbytes
        bia = (3 * hidden + out_f) * 4
        act = 2 * bm_ * max(hidden, out_f) * 4    # intermediate activations (rough)
        wbuf = weight_buffer_count if weight_buffer_count is not None else 2
        return 2 * (x_t + o_t) + wbuf * (w_b + bia) + act

    # Shrink the batch tile until the footprint fits the VMEM budget
    # (budget default 40 MiB keeps headroom under v7x's 64 MiB physical VMEM).
    while bm > SUBLANE and vmem_est(bm) > vmem_budget_bytes:
        bm = max(SUBLANE, _round_up(bm // 2, SUBLANE))

    grid = (pl.cdiv(b_p, bm),)
    vmem_limit = int(min(max(2 * vmem_est(bm), 32 << 20), 48 << 20))

    # Only pad the batch axis (cheap); feature dims stay unpadded in HBM.
    x_p = x_flat if b_p == batch else jnp.pad(x_flat, ((0, b_p - batch), (0, 0)))
    x_p = x_p.astype(compute_dtype)

    def resident(shape):
        # Full-array block, constant index -> stays resident in VMEM across tiles.
        if weight_buffer_count is not None:
            # v7x / large-hidden option: single-buffer the resident weights.
            return pl.BlockSpec(shape, lambda m: (0, 0),
                                pipeline_mode=pl.Buffered(weight_buffer_count))
        return pl.BlockSpec(shape, lambda m: (0, 0))

    out_pad = pl.pallas_call(
        nbeats_block_kernel,
        out_shape=jax.ShapeDtypeStruct((b_p, out_f), jnp.float32),
        grid_spec=pltpu.PrefetchScalarGridSpec(
            num_scalar_prefetch=0,
            grid=grid,
            in_specs=[
                pl.BlockSpec((bm, in_f), lambda m: (m, 0)),         # x batch tile
                resident((in_f, hidden)), resident((1, hidden)),    # fc1
                resident((hidden, hidden)), resident((1, hidden)),  # fc2
                resident((hidden, hidden)), resident((1, hidden)),  # fc3
                resident((hidden, out_f)), resident((1, out_f)),    # fc4
            ],
            out_specs=pl.BlockSpec((bm, out_f), lambda m: (m, 0)),
        ),
        compiler_params=pltpu.CompilerParams(
            dimension_semantics=("parallel",),   # shard batch tiles across TCs
            vmem_limit_bytes=vmem_limit,
        ),
    )(x_p, w1, b1, w2, b2, w3, b3, w4, b4)

    out = out_pad[:batch]
    return out.reshape(batch, n_ahead, output_size)


def init_params(key, num_blocks, input_size, hidden_dim, output_size, n_ahead):
    """Deterministic synthetic weights, stacked along a leading block axis.
    Linear weights stored as (in_features, out_features) (transposed vs nn.Linear)."""
    out_feats = output_size * n_ahead
    keys = jax.random.split(key, 8)
    s = 0.05
    return {
        "w1": s * jax.random.normal(keys[0], (num_blocks, input_size, hidden_dim), jnp.float32),
        "b1": s * jax.random.normal(keys[1], (num_blocks, 1, hidden_dim), jnp.float32),
        "w2": s * jax.random.normal(keys[2], (num_blocks, hidden_dim, hidden_dim), jnp.float32),
        "b2": s * jax.random.normal(keys[3], (num_blocks, 1, hidden_dim), jnp.float32),
        "w3": s * jax.random.normal(keys[4], (num_blocks, hidden_dim, hidden_dim), jnp.float32),
        "b3": s * jax.random.normal(keys[5], (num_blocks, 1, hidden_dim), jnp.float32),
        "w4": s * jax.random.normal(keys[6], (num_blocks, hidden_dim, out_feats), jnp.float32),
        "b4": s * jax.random.normal(keys[7], (num_blocks, 1, out_feats), jnp.float32),
    }


def nbeats_reference(x, params):
    """Pure-JAX reference matching the PyTorch forward (loop overwrites `out`)."""
    batch = x.shape[0]
    xf = x.reshape(batch, -1)
    num_blocks = params["w1"].shape[0]
    out = None
    for i in range(num_blocks):
        h = jnp.maximum(xf @ params["w1"][i] + params["b1"][i], 0.0)
        h = jnp.maximum(h @ params["w2"][i] + params["b2"][i], 0.0)
        h = jnp.maximum(h @ params["w3"][i] + params["b3"][i], 0.0)
        out = h @ params["w4"][i] + params["b4"][i]
    return out


if __name__ == "__main__":
    batch, seq_len, input_dim = 2, 8, 4
    input_size = seq_len * input_dim          # flattened feature dim fed to fc1
    hidden_dim = 32
    output_size = 4
    n_ahead = 3
    num_blocks = 3

    key = jax.random.PRNGKey(0)
    kx, kp = jax.random.split(key)
    x = jax.random.normal(kx, (batch, seq_len, input_dim), jnp.float32)
    params = init_params(kp, num_blocks, input_size, hidden_dim, output_size, n_ahead)

    ref = nbeats_reference(x, params).reshape(batch, n_ahead, output_size)

    # f32 path: exact match against the PyTorch-style reference.
    bp_f32 = prepare_block_params(params, jnp.float32)       # hoisted, call once
    out = nbeats_forward(x, bp_f32, n_ahead=n_ahead, output_size=output_size)
    out = jax.block_until_ready(out)
    assert out.shape == (batch, n_ahead, output_size)
    assert jnp.allclose(out, ref, atol=1e-5, rtol=1e-5)

    # bf16 operand path (v5e/v6e/v7x): MXU-native weights/x, f32 bias/ReLU/accum.
    bp_bf16 = prepare_block_params(params, jnp.bfloat16)
    out_bf16 = nbeats_forward(x, bp_bf16, n_ahead=n_ahead, output_size=output_size)
    out_bf16 = jax.block_until_ready(out_bf16)
    assert jnp.allclose(out_bf16, ref, atol=5e-2, rtol=5e-2)

    print("KERNEL_OK")
</pallas_src>

<mosaic_0001>
module attributes {stable_mosaic.version = 11 : i64} {
  func.func @nbeats_block_kernel(%arg0: i32, %arg1: memref<8x32xf32, #tpu.memory_space<vmem>>, %arg2: memref<32x32xf32, #tpu.memory_space<vmem>>, %arg3: memref<1x32xf32, #tpu.memory_space<vmem>>, %arg4: memref<32x32xf32, #tpu.memory_space<vmem>>, %arg5: memref<1x32xf32, #tpu.memory_space<vmem>>, %arg6: memref<32x32xf32, #tpu.memory_space<vmem>>, %arg7: memref<1x32xf32, #tpu.memory_space<vmem>>, %arg8: memref<32x12xf32, #tpu.memory_space<vmem>>, %arg9: memref<1x12xf32, #tpu.memory_space<vmem>>, %arg10: memref<8x12xf32, #tpu.memory_space<vmem>>) attributes {dimension_semantics = [#tpu.dimension_semantics<parallel>], iteration_bounds = array<i64: 1>, scalar_prefetch = 0 : i64, scratch_operands = 0 : i64, tpu.core_type = #tpu.core_type<tc>, window_params = [{transform_indices = @transform_0, window_bounds = array<i64: 8, 32>}, {pipeline_mode = #tpu.pipeline_mode<synchronous>, transform_indices = @transform_1, window_bounds = array<i64: 32, 32>}, {pipeline_mode = #tpu.pipeline_mode<synchronous>, transform_indices = @transform_2, window_bounds = array<i64: 1, 32>}, {pipeline_mode = #tpu.pipeline_mode<synchronous>, transform_indices = @transform_3, window_bounds = array<i64: 32, 32>}, {pipeline_mode = #tpu.pipeline_mode<synchronous>, transform_indices = @transform_4, window_bounds = array<i64: 1, 32>}, {pipeline_mode = #tpu.pipeline_mode<synchronous>, transform_indices = @transform_5, window_bounds = array<i64: 32, 32>}, {pipeline_mode = #tpu.pipeline_mode<synchronous>, transform_indices = @transform_6, window_bounds = array<i64: 1, 32>}, {pipeline_mode = #tpu.pipeline_mode<synchronous>, transform_indices = @transform_7, window_bounds = array<i64: 32, 12>}, {pipeline_mode = #tpu.pipeline_mode<synchronous>, transform_indices = @transform_8, window_bounds = array<i64: 1, 12>}, {transform_indices = @transform_9, window_bounds = array<i64: 8, 12>}]} {
    %c0 = arith.constant 0 : index
    %c0_0 = arith.constant 0 : index
    %0 = vector.load %arg1[%c0, %c0_0] : memref<8x32xf32, #tpu.memory_space<vmem>>, vector<8x32xf32>
    %c0_1 = arith.constant 0 : index
    %c0_2 = arith.constant 0 : index
    %1 = vector.load %arg2[%c0_1, %c0_2] : memref<32x32xf32, #tpu.memory_space<vmem>>, vector<32x32xf32>
    %cst = arith.constant dense<0.000000e+00> : vector<8x32xf32>
    %2 = tpu.matmul %0, %1, %cst {dimension_numbers = #tpu.dot_dimension_numbers<[1], [0], [0], [1], [0, 0, 1, 1], [], []>} : vector<8x32xf32>, vector<32x32xf32>, vector<8x32xf32> -> vector<8x32xf32>
    %c0_3 = arith.constant 0 : index
    %c0_4 = arith.constant 0 : index
    %3 = vector.load %arg3[%c0_3, %c0_4] : memref<1x32xf32, #tpu.memory_space<vmem>>, vector<1x32xf32>
    %4 = vector.broadcast %3 : vector<1x32xf32> to vector<8x32xf32>
    %5 = arith.addf %2, %4 : vector<8x32xf32>
    %cst_5 = arith.constant 0.000000e+00 : f32
    %6 = vector.broadcast %cst_5 : f32 to vector<8x32xf32>
    %7 = arith.maximumf %5, %6 : vector<8x32xf32>
    %c0_6 = arith.constant 0 : index
    %c0_7 = arith.constant 0 : index
    %8 = vector.load %arg4[%c0_6, %c0_7] : memref<32x32xf32, #tpu.memory_space<vmem>>, vector<32x32xf32>
    %cst_8 = arith.constant dense<0.000000e+00> : vector<8x32xf32>
    %9 = tpu.matmul %7, %8, %cst_8 {dimension_numbers = #tpu.dot_dimension_numbers<[1], [0], [0], [1], [0, 0, 1, 1], [], []>} : vector<8x32xf32>, vector<32x32xf32>, vector<8x32xf32> -> vector<8x32xf32>
    %c0_9 = arith.constant 0 : index
    %c0_10 = arith.constant 0 : index
    %10 = vector.load %arg5[%c0_9, %c0_10] : memref<1x32xf32, #tpu.memory_space<vmem>>, vector<1x32xf32>
    %11 = vector.broadcast %10 : vector<1x32xf32> to vector<8x32xf32>
    %12 = arith.addf %9, %11 : vector<8x32xf32>
    %cst_11 = arith.constant 0.000000e+00 : f32
    %13 = vector.broadcast %cst_11 : f32 to vector<8x32xf32>
    %14 = arith.maximumf %12, %13 : vector<8x32xf32>
    %c0_12 = arith.constant 0 : index
    %c0_13 = arith.constant 0 : index
    %15 = vector.load %arg6[%c0_12, %c0_13] : memref<32x32xf32, #tpu.memory_space<vmem>>, vector<32x32xf32>
    %cst_14 = arith.constant dense<0.000000e+00> : vector<8x32xf32>
    %16 = tpu.matmul %14, %15, %cst_14 {dimension_numbers = #tpu.dot_dimension_numbers<[1], [0], [0], [1], [0, 0, 1, 1], [], []>} : vector<8x32xf32>, vector<32x32xf32>, vector<8x32xf32> -> vector<8x32xf32>
    %c0_15 = arith.constant 0 : index
    %c0_16 = arith.constant 0 : index
    %17 = vector.load %arg7[%c0_15, %c0_16] : memref<1x32xf32, #tpu.memory_space<vmem>>, vector<1x32xf32>
    %18 = vector.broadcast %17 : vector<1x32xf32> to vector<8x32xf32>
    %19 = arith.addf %16, %18 : vector<8x32xf32>
    %cst_17 = arith.constant 0.000000e+00 : f32
    %20 = vector.broadcast %cst_17 : f32 to vector<8x32xf32>
    %21 = arith.maximumf %19, %20 : vector<8x32xf32>
    %c0_18 = arith.constant 0 : index
    %c0_19 = arith.constant 0 : index
    %22 = vector.load %arg8[%c0_18, %c0_19] : memref<32x12xf32, #tpu.memory_space<vmem>>, vector<32x12xf32>
    %cst_20 = arith.constant dense<0.000000e+00> : vector<8x12xf32>
    %23 = tpu.matmul %21, %22, %cst_20 {dimension_numbers = #tpu.dot_dimension_numbers<[1], [0], [0], [1], [0, 0, 1, 1], [], []>} : vector<8x32xf32>, vector<32x12xf32>, vector<8x12xf32> -> vector<8x12xf32>
    %c0_21 = arith.constant 0 : index
    %c0_22 = arith.constant 0 : index
    %24 = vector.load %arg9[%c0_21, %c0_22] : memref<1x12xf32, #tpu.memory_space<vmem>>, vector<1x12xf32>
    %25 = vector.broadcast %24 : vector<1x12xf32> to vector<8x12xf32>
    %26 = arith.addf %23, %25 : vector<8x12xf32>
    %c0_23 = arith.constant 0 : index
    %c0_24 = arith.constant 0 : index
    %27 = vector.load %arg10[%c0_23, %c0_24] : memref<8x12xf32, #tpu.memory_space<vmem>>, vector<8x12xf32>
    tpu.vector_store %arg10[%c0_23, %c0_24], %26 {strides = array<i32>} : memref<8x12xf32, #tpu.memory_space<vmem>>, vector<8x12xf32>,
    return
  }
  func.func @transform_0(%arg0: i32) -> (i32, i32) {
    %c0_i32 = arith.constant 0 : i32
    %c0_i32_0 = arith.constant 0 : i32
    return %arg0, %c0_i32 : i32, i32
  }
  func.func @transform_1(%arg0: i32) -> (i32, i32) {
    %c0_i32 = arith.constant 0 : i32
    %c0_i32_0 = arith.constant 0 : i32
    %c0_i32_1 = arith.constant 0 : i32
    return %c0_i32, %c0_i32_0 : i32, i32
  }
  func.func @transform_2(%arg0: i32) -> (i32, i32) {
    %c0_i32 = arith.constant 0 : i32
    %c0_i32_0 = arith.constant 0 : i32
    %c0_i32_1 = arith.constant 0 : i32
    return %c0_i32, %c0_i32_0 : i32, i32
  }
  func.func @transform_3(%arg0: i32) -> (i32, i32) {
    %c0_i32 = arith.constant 0 : i32
    %c0_i32_0 = arith.constant 0 : i32
    %c0_i32_1 = arith.constant 0 : i32
    return %c0_i32, %c0_i32_0 : i32, i32
  }
  func.func @transform_4(%arg0: i32) -> (i32, i32) {
    %c0_i32 = arith.constant 0 : i32
    %c0_i32_0 = arith.constant 0 : i32
    %c0_i32_1 = arith.constant 0 : i32
    return %c0_i32, %c0_i32_0 : i32, i32
  }
  func.func @transform_5(%arg0: i32) -> (i32, i32) {
    %c0_i32 = arith.constant 0 : i32
    %c0_i32_0 = arith.constant 0 : i32
    %c0_i32_1 = arith.constant 0 : i32
    return %c0_i32, %c0_i32_0 : i32, i32
  }
  func.func @transform_6(%arg0: i32) -> (i32, i32) {
    %c0_i32 = arith.constant 0 : i32
    %c0_i32_0 = arith.constant 0 : i32
    %c0_i32_1 = arith.constant 0 : i32
    return %c0_i32, %c0_i32_0 : i32, i32
  }
  func.func @transform_7(%arg0: i32) -> (i32, i32) {
    %c0_i32 = arith.constant 0 : i32
    %c0_i32_0 = arith.constant 0 : i32
    %c0_i32_1 = arith.constant 0 : i32
    return %c0_i32, %c0_i32_0 : i32, i32
  }
  func.func @transform_8(%arg0: i32) -> (i32, i32) {
    %c0_i32 = arith.constant 0 : i32
    %c0_i32_0 = arith.constant 0 : i32
    %c0_i32_1 = arith.constant 0 : i32
    return %c0_i32, %c0_i32_0 : i32, i32
  }
  func.func @transform_9(%arg0: i32) -> (i32, i32) {
    %c0_i32 = arith.constant 0 : i32
    %c0_i32_0 = arith.constant 0 : i32
    return %arg0, %c0_i32 : i32, i32
  }
}

</mosaic_0001>

<bundles_post_ra>
// kernel: tpu_custom_call.1
= control target key start
LH: loop header
LB: loop body
LE: loop exit
PB: predicated region body
PF: predicated region fallthrough
CT: control target
= control target key end

     0   :  { %14 = vsyncpa [#allocation3], 0  ;;  %s751_s0 = inlined_call_operand.hbm [shape: f32[8,32], index: 0, kind: input, shape index: {}]   ;;  %s752_s1 = inlined_call_operand.vmem [shape: f32[32,32], index: 1, kind: input, shape index: {}]   ;;  %s753_s2 = inlined_call_operand.vmem [shape: f32[1,32], index: 2, kind: input, shape index: {}]   ;;  %s754_s3 = inlined_call_operand.hbm [shape: f32[32,32], index: 3, kind: input, shape index: {}]   ;;  %s755_s4 = inlined_call_operand.vmem [shape: f32[1,32], index: 4, kind: input, shape index: {}]   ;;  %s756_s5 = inlined_call_operand.vmem [shape: f32[32,32], index: 5, kind: input, shape index: {}]   ;;  %s757_s6 = inlined_call_operand.vmem [shape: f32[1,32], index: 6, kind: input, shape index: {}]   ;;  %s758_s7 = inlined_call_operand.vmem [shape: f32[32,12], index: 7, kind: input, shape index: {}]   ;;  %s759_s8 = inlined_call_operand.vmem [shape: f32[1,12], index: 8, kind: input, shape index: {}]   ;;  %s760_s9 = inlined_call_operand.hbm [shape: f32[8,12], index: 9, kind: output, shape index: {}]  }
   0x1   :  { %15 = vsyncpa [#allocation6], 0 }
   0x2   :  { %16 = vsyncpa [#allocation4], 0  ;;  %s594_s30 = smov [#allocation2]   ;;  %s595_s11 = smov [#allocation5]  }
   0x3   :  { %s23_s10 = sshll.u32 %s594_s30, 4  ;;  %s36_s12 = sshll.u32 %s595_s11, 4  ;;  %s24_s10 = int_to_ptr.vmem [resolvable:$true] %s23_s10  ;;  %s652_s12 = int_to_ptr.vmem [resolvable:$true] %s36_s12 }
   0x4   :  { %s522_s15 = scalar_lea.hbm %s751_s0, 128 }
   0x5   :  { %p523_p0 = scmp.ne.s32.totalorder %s751_s0, %s522_s15  ;;  %p526_p1 = scmp.lt.u32.totalorder %s522_s15, %s751_s0 }
   0x7   :  { %p528_p2 = pnand %p526_p1, %p523_p0 }
   0x9   :  { %531 = shalt.err (!%p528_p2)
}
   0xa   :  { %s532_s20 = scalar_lea.vmem %s24_s10, 128  ;;  %p537_p4 = scmp.lt.s32.totalorder %s24_s10, %s24_s10 }
   0xb   :  { %p533_p3 = scmp.ne.s32.totalorder %s24_s10, %s532_s20  ;;  %p538_p5 = scmp.lt.s32.totalorder %s532_s20, %s532_s20 }
   0xd   :  { %p539_p6 = por %p538_p5, %p537_p4 }
   0xf   :  { %p540_p7 = pnand %p539_p6, %p533_p3 }
  0x11   :  { %543 = shalt.err (!%p540_p7)
}
  0x12   :  { %26 = dma.hbm_to_vmem [thread:$0]  %s751_s0, 128, %s24_s10, [#allocation3]  }
  0x13   :  { %s544_s25 = scalar_lea.hbm %s754_s3, 512 }
  0x14   :  { %p545_p8 = scmp.ne.s32.totalorder %s754_s3, %s544_s25  ;;  %p548_p9 = scmp.lt.u32.totalorder %s544_s25, %s754_s3 }
  0x16   :  { %p550_p10 = pnand %p548_p9, %p545_p8 }
  0x18   :  { %553 = shalt.err (!%p550_p10)
}
  0x19   :  { %s554_s30 = scalar_lea.vmem %s652_s12, 512  ;;  %p559_p12 = scmp.lt.s32.totalorder %s652_s12, %s652_s12 }
  0x1a   :  { %p555_p11 = scmp.ne.s32.totalorder %s652_s12, %s554_s30  ;;  %p560_p13 = scmp.lt.s32.totalorder %s554_s30, %s554_s30 }
  0x1c   :  { %p561_p0 = por %p560_p13, %p559_p12 }
  0x1e   :  { %p562_p1 = pnand %p561_p0, %p555_p11 }
  0x20   :  { %565 = shalt.err (!%p562_p1)
}
  0x21   :  { %s596_s0 = smov 128   ;;  %s597_s10 = smov 8  }
  0x22   :  { %42 = dma.hbm_to_vmem [thread:$0]  %s754_s3, 512, %s652_s12, [#allocation6], %s596_s0, %s596_s0, %s597_s10  }
  0x23   :  { %588 = dma.done.wait [#allocation3], 128  }
  0x24   :  { %589 = vsyncadd [#allocation3], 4294967168 }
  0x25   :  { %590 = dma.done.wait [#allocation6], 512  }
  0x26   :  { %591 = vsyncadd [#allocation6], 4294966784  ;;  %v598_v0 = vmov 0.0|0.0   ;;  %vm599_vm0 = vmmov 0   ;;  %v600_v1 = vmov 0.0   ;;  %v60_v2 = vld [vmem:[%s752_s1] sm:$0xff] }
  0x27   :  { %490 = vmatprep.subr.bf16.mxu0 %v598_v0  ;;  %454 = vmatprep.mubr.msk.f32.mxu0 %vm599_vm0, %v600_v1  ;;  %v61_v3 = vld [vmem:[%s752_s1 + $0x8] sm:$0xff]  ;;  %v62_v4 = vld [vmem:[%s752_s1 + $0x10] sm:$0xff]  ;;  %v63_v6 = vld [vmem:[%s752_s1 + $0x18] sm:$0xff]  ;;  %vm71_vm1 = vcmask 261120   ;;  %s601_s12 = smov [#allocation7]   ;;  %vm400_vm2 = vcmask 97280  }
  0x28   :  { %496 = vmatprep.subr.bf16.mxu1 %v598_v0  ;;  %465 = vmatprep.mubr.msk.f32.mxu1 %vm599_vm0, %v600_v1  ;;  %v491_v5 = vpack.c.bf16 %v61_v3, %v60_v2  ;;  %v146_v7 = vld [vmem:[#allocation5] sm:$0xff]  ;;  %v147_v8 = vld [vmem:[#allocation5 + $0x8] sm:$0xff]  ;;  %v494_v9 = vpack.c.bf16 %v63_v6, %v62_v4  ;;  %v59_v11 = vld [vmem:[#allocation2] sm:$0xff]  ;;  %s408_s18 = sshll.u32 %s601_s12, 4  ;;  %s409_s18 = int_to_ptr.vmem [resolvable:$true] %s408_s18 }
  0x29   :  { %v497_v10 = vpack.c.bf16 %v147_v8, %v146_v7  ;;  %v148_v12 = vld [vmem:[#allocation5 + $0x10] sm:$0xff]  ;;  %v149_v13 = vld [vmem:[#allocation5 + $0x18] sm:$0xff]  ;;  %v232_v16 = vld [vmem:[%s756_s5 + $0x8] sm:$0xff]  ;;  %p571_p3 = scmp.lt.s32.totalorder %s409_s18, %s409_s18 }
  0x2a   :  { %492 = vmatpush3.bf16.msra.mxu0 %v491_v5  ;;  %v500_v14 = vpack.c.bf16 %v149_v13, %v148_v12  ;;  %v231_v15 = vld [vmem:[%s756_s5] sm:$0xff]  ;;  %v233_v23 = vld [vmem:[%s756_s5 + $0x10] sm:$0xff]  ;;  %v234_v24 = vld [vmem:[%s756_s5 + $0x18] sm:$0xff] }
  0x2b   :  { %493 = vmatprep.subr.bf16.mxu0 %v598_v0  ;;  %498 = vmatpush3.bf16.msra.mxu1 %v497_v10  ;;  %v503_v17 = vpack.c.bf16 %v232_v16, %v231_v15  ;;  %v418_v18 = vld [vmem:[%s753_s2] ss:$0 sm:$0xff]  ;;  %v506_v25 = vpack.c.bf16 %v234_v24, %v233_v23  ;;  %v317_v27 = vld [vmem:[%s758_s7 + $0x8] sm:$0xff]  ;;  %v318_v34 = vld [vmem:[%s758_s7 + $0x10] sm:$0xff] }
  0x2c   :  { %499 = vmatprep.subr.bf16.mxu1 %v598_v0  ;;  %v316_v26 = vld [vmem:[%s758_s7] sm:$0xff]  ;;  %v319_v35 = vld [vmem:[%s758_s7 + $0x18] sm:$0xff]  ;;  %s566_s7 = scalar_lea.vmem %s409_s18, 128 }
  0x2d   :  { %v509_v28 = vpack.c.bf16 %v317_v27, %v316_v26  ;;  %v420_v29 = vld [vmem:[%s755_s4] ss:$0 sm:$0xff]  ;;  %v512_v36 = vpack.c.bf16 %v319_v35, %v318_v34  ;;  %p567_p2 = scmp.ne.s32.totalorder %s409_s18, %s566_s7  ;;  %p572_p4 = scmp.lt.s32.totalorder %s566_s7, %s566_s7 }
  0x2e   :  { %495 = vmatpush3.bf16.msra.mxu0 %v494_v9  ;;  %v422_v37 = vld [vmem:[%s757_s6] ss:$0 sm:$0xff] }
  0x2f   :  { %502 = vmatprep.subr.bf16.mxu0 %v598_v0  ;;  %501 = vmatpush3.bf16.msra.mxu1 %v500_v14  ;;  %v424_v42 = vld [vmem:[%s759_s8] ss:$0 sm:$0xff]  ;;  %p573_p5 = por %p572_p4, %p571_p3 }
  0x30   :  { %508 = vmatprep.subr.bf16.mxu1 %v598_v0 }
  0x31   :  { %455 = vmatmul.mubr.msk.f32.vlgmr.msra.gmra.mrb[0].mxu0 %vm71_vm1, %v59_v11  ;;  %p574_p6 = pnand %p573_p5, %p567_p2 }
  0x32   :  { %476 = vmatprep.mubr.msk.f32.mxu0 %vm599_vm0, %v600_v1  ;;  %504 = vmatpush3.bf16.msra.mxu0 %v503_v17 }
  0x33   :  { %505 = vmatprep.subr.bf16.mxu0 %v598_v0 }
  0x36   :  { %507 = vmatpush3.bf16.msra.mxu0 %v506_v25 }
 0x104   :  { %v141_v19 = vpop.f32.mrb[0].mxu0 }
 0x105   :  { %v142_v20 = vadd.f32 %v418_v18, %v141_v19  ;;  %v456_v21 = vpop.f32.mrb[1].mxu0 }
 0x107   :  { %v145_v22 = vmax.f32 %v142_v20, 0.0 }
 0x109   :  { %466 = vmatmul.mubr.msk.f32.vlgmr.msra.gmra.mrb[0].mxu1 %vm71_vm1, %v145_v22 }
 0x10a   :  { %487 = vmatprep.mubr.msk.f32.mxu1 %vm599_vm0, %v600_v1  ;;  %510 = vmatpush3.bf16.msra.mxu1 %v509_v28 }
 0x10b   :  { %511 = vmatprep.subr.bf16.mxu1 %v598_v0 }
 0x10e   :  { %513 = vmatpush3.bf16.msra.mxu1 %v512_v36 }
 0x1dc   :  { %v226_v30 = vpop.f32.mrb[0].mxu1 }
 0x1dd   :  { %v227_v31 = vadd.f32 %v420_v29, %v226_v30  ;;  %v467_v32 = vpop.f32.mrb[1].mxu1 }
 0x1df   :  { %v230_v33 = vmax.f32 %v227_v31, 0.0 }
 0x1e1   :  { %477 = vmatmul.mubr.msk.f32.vlgmr.msra.gmra.mrb[2].mxu0 %vm71_vm1, %v230_v33 }
 0x2b4   :  { %v311_v38 = vpop.f32.mrb[2].mxu0 }
 0x2b5   :  { %v312_v39 = vadd.f32 %v422_v37, %v311_v38  ;;  %v478_v40 = vpop.f32.mrb[3].mxu0 }
 0x2b7   :  { %v315_v41 = vmax.f32 %v312_v39, 0.0 }
 0x2b9   :  { %488 = vmatmul.mubr.msk.f32.vlgmr.msra.gmra.mrb[2].mxu1 %vm71_vm1, %v315_v41 }
 0x38c   :  { %v396_v43 = vpop.f32.mrb[2].mxu1 }
 0x38d   :  { %v397_v44 = vadd.f32 %v424_v42, %v396_v43  ;;  %v489_v45 = vpop.f32.mrb[3].mxu1 }
 0x38f   :  { %401 = vst.msk [vmem:[#allocation7] sm:$0xff] %vm400_vm2, %v397_v44 }
 0x390   :  { %577 = shalt.err (!%p574_p6)
}
 0x391   :  { %s578_s1 = scalar_lea.hbm %s760_s9, 128 }
 0x392   :  { %p579_p7 = scmp.ne.s32.totalorder %s760_s9, %s578_s1  ;;  %p582_p8 = scmp.lt.u32.totalorder %s578_s1, %s760_s9 }
 0x394   :  { %p584_p9 = pnand %p582_p8, %p579_p7 }
 0x396   :  { %587 = shalt.err (!%p584_p9)
}
 0x397   :  { %411 = dma.vmem_to_hbm [thread:$0]  %s409_s18, 128, %s760_s9, [#allocation4]  }
 0x398   :  { %592 = dma.done.wait [#allocation4], 128  }
 0x399   :  { %593 = vsyncadd [#allocation4], 4294967168 }
 0x39a   :  { %415 = vsyncpa [#allocation3], 1 }
 0x39b   :  { %416 = vsyncpa [#allocation6], 1 }
 0x39c   :  { %417 = vsyncpa [#allocation4], 1 }

</bundles_post_ra>
